<compile_context>
chip_gen: v7x
topology: tpu7x:2x2x1
jax: 0.10.0
libtpu: 0.0.40
codegen_flags: <defaults>
</compile_context>

<pallas_src>
import jax
import jax.numpy as jnp
from jax.experimental import pallas as pl
from jax.experimental.pallas import tpu as pltpu

BN_EPS = 1e-5  # torch.nn.BatchNorm1d default eps
_MAX_TS = 1024  # max samples per grid step (lane-axis tile)


# --------------------------- shared math ---------------------------------- #

def _folding_math_T(sc1b, fc1_col, fc2b_col,
                    w12T, b12c, w13T, b13c,
                    w2dT, w22T, b22c, w23T, b23c):
    """Transposed-layout forward for one batch element / one sample tile.

    sc1b:     (H, TS) f32  seed @ W1_seed + b1 (batch-invariant, precomputed)
    fc1_col:  (H, 1)  f32  x @ W1_feat          (per batch)
    fc2b_col: (H, 1)  f32  x @ W2_feat + b2      (per batch)
    Returns fd2: (3, TS) f32.
    """
    bf16, f32 = jnp.bfloat16, jnp.float32

    # ---------------- folding1: conv1+BN1, ReLU, conv2+BN2, ReLU, conv3 ----
    h = jnp.maximum(sc1b + fc1_col, 0.0)                                # (H, TS)
    h2 = jnp.dot(w12T, h.astype(bf16), preferred_element_type=f32) + b12c
    h2 = jnp.maximum(h2, 0.0)                                           # (H2, TS)
    fd1 = jnp.dot(w13T, h2.astype(bf16), preferred_element_type=f32) + b13c  # (3, TS)

    # ---------------- folding2 --------------------------------------------
    # K=3 contraction kept on the VPU in f32 (outer-product sum) instead of a
    # degenerate-K MXU pass.
    dc2 = (w2dT[:, 0:1] * fd1[0:1, :]
           + w2dT[:, 1:2] * fd1[1:2, :]
           + w2dT[:, 2:3] * fd1[2:3, :])                                # (H, TS)
    g = jnp.maximum(dc2 + fc2b_col, 0.0)
    g2 = jnp.dot(w22T, g.astype(bf16), preferred_element_type=f32) + b22c
    g2 = jnp.maximum(g2, 0.0)                                           # (H2, TS)
    fd2 = jnp.dot(w23T, g2.astype(bf16), preferred_element_type=f32) + b23c  # (3, TS)
    return fd2


# ------------------------------ kernel ------------------------------------ #

def prenet_kernel(fc1_ref, fc2b_ref, sc1b_ref,
                  w12_ref, b12_ref, w13_ref, b13_ref,
                  w2d_ref, w22_ref, b22_ref, w23_ref, b23_ref,
                  o_ref):
    fd2 = _folding_math_T(
        sc1b_ref[...], fc1_ref[0], fc2b_ref[0],
        w12_ref[...], b12_ref[...], w13_ref[...], b13_ref[...],
        w2d_ref[...], w22_ref[...], b22_ref[...], w23_ref[...], b23_ref[...])
    o_ref[0] = fd2.astype(o_ref.dtype)   # lane-dense (3, TS) write


# ------------------------------ wrapper ------------------------------------ #

def make_folding_seed(step):
    # TODO(synk): `folding_seed` is not defined in the provided __init__; this
    # builds the standard FoldingNet 2D grid in [-1, 1], shape (step*step, 2).
    a = jnp.linspace(-1.0, 1.0, step, dtype=jnp.float32)
    gx = jnp.tile(a.reshape(1, step), (step, 1)).reshape(-1)
    gy = jnp.tile(a.reshape(step, 1), (1, step)).reshape(-1)
    return jnp.stack([gx, gy], axis=-1)                      # (S, 2)


def init_params(key, in_channel, hidden_dim=512):
    h, h2 = hidden_dim, hidden_dim // 2
    ks = jax.random.split(key, 6)

    def conv(k, cin, cout):
        kw, kb = jax.random.split(k)
        bound = 1.0 / (cin ** 0.5)
        w = jax.random.uniform(kw, (cin, cout), jnp.float32, -bound, bound)
        b = jax.random.uniform(kb, (cout,), jnp.float32, -bound, bound)
        return w, b

    def bn(c):
        return {"gamma": jnp.ones((c,), jnp.float32),
                "beta": jnp.zeros((c,), jnp.float32),
                "mean": jnp.zeros((c,), jnp.float32),
                "var": jnp.ones((c,), jnp.float32)}

    return {
        "f1_c1": conv(ks[0], in_channel + 2, h), "f1_bn1": bn(h),
        "f1_c2": conv(ks[1], h, h2),             "f1_bn2": bn(h2),
        "f1_c3": conv(ks[2], h2, 3),
        "f2_c1": conv(ks[3], in_channel + 3, h), "f2_bn1": bn(h),
        "f2_c2": conv(ks[4], h, h2),             "f2_bn2": bn(h2),
        "f2_c3": conv(ks[5], h2, 3),
    }


def _fold_bn(conv_wb, bn_p):
    # TODO(synk): training-mode BatchNorm (batch statistics) is not implemented;
    # eval-mode running stats are folded into the conv as a per-channel affine.
    w, b = conv_wb
    scale = bn_p["gamma"] * jax.lax.rsqrt(bn_p["var"] + BN_EPS)
    return w * scale[None, :], scale * (b - bn_p["mean"]) + bn_p["beta"]


def _choose_ts(S):
    """Sample-axis (lane) tile: full S when small, else a /128 divisor of S."""
    if S <= _MAX_TS:
        return S
    for cand in (1024, 896, 768, 640, 512, 384, 256, 128):
        if S % cand == 0:
            return cand
    return S


def _prepare_args(x, params, step, hidden_dim):
    bs, _ = x.shape
    bf = jnp.bfloat16

    w11, b11 = _fold_bn(params["f1_c1"], params["f1_bn1"])
    w12, b12 = _fold_bn(params["f1_c2"], params["f1_bn2"])
    w13, b13 = params["f1_c3"]
    w21, b21 = _fold_bn(params["f2_c1"], params["f2_bn1"])
    w22, b22 = _fold_bn(params["f2_c2"], params["f2_bn2"])
    w23, b23 = params["f2_c3"]

    seed = make_folding_seed(step)                        # (S, 2) f32

    # Batch-invariant seed branch of folding1's first conv (+ folded bias),
    # transposed: channels on sublanes, samples on lanes.  Computed once.
    sc1bT = (seed @ w11[:2] + b11[None, :]).T             # (H, S) f32

    # Per-batch feature projections of both first convs: one tiny XLA matmul
    # each for the whole batch (instead of M=1 MXU passes per grid step).
    fc1_all = (x @ w11[2:])[:, :, None]                   # (bs, H, 1) f32
    fc2b_all = (x @ w21[3:] + b21[None, :])[:, :, None]   # (bs, H, 1) f32

    return (
        fc1_all, fc2b_all, sc1bT,
        # folding1 remaining layers (weights pre-transposed to (out, in)):
        w12.T.astype(bf), b12[:, None],
        w13.T.astype(bf), b13[:, None],
        # folding2: torch cat([fd1, features]) -> rows [0:3]=fd1 part:
        w21[:3].T,                                        # (H, 3) f32, VPU path
        w22.T.astype(bf), b22[:, None],
        w23.T.astype(bf), b23[:, None],
    )


def prenet_forward(x, params, step, hidden_dim):
    bs, _ = x.shape
    S = step * step
    H = hidden_dim
    TS = _choose_ts(S)
    args = _prepare_args(x, params, step, hidden_dim)

    in_specs = [
        pl.BlockSpec((1, H, 1), lambda b, s: (b, 0, 0)),   # fc1 per batch
        pl.BlockSpec((1, H, 1), lambda b, s: (b, 0, 0)),   # fc2 + b21 per batch
        pl.BlockSpec((H, TS), lambda b, s: (0, s)),        # seed branch + b11
    ]
    # Weights/biases: constant block index -> stay VMEM-resident across steps.
    in_specs += [pl.BlockSpec(a.shape, lambda b, s, nd=a.ndim: (0,) * nd)
                 for a in args[3:]]

    out = pl.pallas_call(
        prenet_kernel,
        out_shape=jax.ShapeDtypeStruct((bs, 3, S), jnp.float32),
        grid=(bs, S // TS),
        in_specs=in_specs,
        out_specs=pl.BlockSpec((1, 3, TS), lambda b, s: (b, 0, s)),
        compiler_params=pltpu.CompilerParams(
            dimension_semantics=("parallel", "parallel"),
            vmem_limit_bytes=32 * 1024 * 1024),
    )(*args)

    return out   # (bs, 3, num_sample) — torch layout, no wrapper transpose


def prenet_reference(x, params, step, hidden_dim):
    """Pure-JAX reference using identical math (for validation)."""
    args = _prepare_args(x, params, step, hidden_dim)
    fc1_all, fc2b_all, sc1bT = args[0], args[1], args[2]
    rest = args[3:]

    def one(fc1, fc2b):
        return _folding_math_T(sc1bT, fc1, fc2b, *rest)

    return jax.vmap(one)(fc1_all, fc2b_all)               # (bs, 3, S)


if __name__ == "__main__":
    bs, in_channel, step, hidden_dim = 2, 32, 4, 128   # num_sample = 16

    key = jax.random.PRNGKey(0)
    kx, kp = jax.random.split(key)
    x = jax.random.normal(kx, (bs, in_channel), jnp.float32)
    params = init_params(kp, in_channel, hidden_dim)

    out = prenet_forward(x, params, step, hidden_dim)
    jax.block_until_ready(out)

    assert out.shape == (bs, 3, step * step) and out.dtype == jnp.float32
    assert bool(jnp.all(jnp.isfinite(out)))

    ref = prenet_reference(x, params, step, hidden_dim)
    assert jnp.allclose(out, ref, atol=1e-2, rtol=1e-2), \
        float(jnp.max(jnp.abs(out - ref)))

    print("KERNEL_OK")
</pallas_src>

<mosaic_0001>
module attributes {stable_mosaic.version = 11 : i64} {
  func.func @prenet_kernel(%arg0: i32, %arg1: i32, %arg2: memref<1x128x1xf32, #tpu.memory_space<vmem>>, %arg3: memref<1x128x1xf32, #tpu.memory_space<vmem>>, %arg4: memref<128x16xf32, #tpu.memory_space<vmem>>, %arg5: memref<64x128xbf16, #tpu.memory_space<vmem>>, %arg6: memref<64x1xf32, #tpu.memory_space<vmem>>, %arg7: memref<3x64xbf16, #tpu.memory_space<vmem>>, %arg8: memref<3x1xf32, #tpu.memory_space<vmem>>, %arg9: memref<128x3xf32, #tpu.memory_space<vmem>>, %arg10: memref<64x128xbf16, #tpu.memory_space<vmem>>, %arg11: memref<64x1xf32, #tpu.memory_space<vmem>>, %arg12: memref<3x64xbf16, #tpu.memory_space<vmem>>, %arg13: memref<3x1xf32, #tpu.memory_space<vmem>>, %arg14: memref<1x3x16xf32, #tpu.memory_space<vmem>>) attributes {dimension_semantics = [#tpu.dimension_semantics<parallel>, #tpu.dimension_semantics<parallel>], iteration_bounds = array<i64: 2, 1>, scalar_prefetch = 0 : i64, scratch_operands = 0 : i64, tpu.core_type = #tpu.core_type<tc>, window_params = [{transform_indices = @transform_0, window_bounds = array<i64: 1, 128, 1>}, {transform_indices = @transform_1, window_bounds = array<i64: 1, 128, 1>}, {transform_indices = @transform_2, window_bounds = array<i64: 128, 16>}, {pipeline_mode = #tpu.pipeline_mode<synchronous>, transform_indices = @transform_3, window_bounds = array<i64: 64, 128>}, {pipeline_mode = #tpu.pipeline_mode<synchronous>, transform_indices = @transform_4, window_bounds = array<i64: 64, 1>}, {pipeline_mode = #tpu.pipeline_mode<synchronous>, transform_indices = @transform_5, window_bounds = array<i64: 3, 64>}, {pipeline_mode = #tpu.pipeline_mode<synchronous>, transform_indices = @transform_6, window_bounds = array<i64: 3, 1>}, {pipeline_mode = #tpu.pipeline_mode<synchronous>, transform_indices = @transform_7, window_bounds = array<i64: 128, 3>}, {pipeline_mode = #tpu.pipeline_mode<synchronous>, transform_indices = @transform_8, window_bounds = array<i64: 64, 128>}, {pipeline_mode = #tpu.pipeline_mode<synchronous>, transform_indices = @transform_9, window_bounds = array<i64: 64, 1>}, {pipeline_mode = #tpu.pipeline_mode<synchronous>, transform_indices = @transform_10, window_bounds = array<i64: 3, 64>}, {pipeline_mode = #tpu.pipeline_mode<synchronous>, transform_indices = @transform_11, window_bounds = array<i64: 3, 1>}, {transform_indices = @transform_12, window_bounds = array<i64: 1, 3, 16>}]} {
    %c0 = arith.constant 0 : index
    %c0_0 = arith.constant 0 : index
    %0 = vector.load %arg4[%c0, %c0_0] : memref<128x16xf32, #tpu.memory_space<vmem>>, vector<128x16xf32>
    %c0_1 = arith.constant 0 : index
    %c0_2 = arith.constant 0 : index
    %c0_3 = arith.constant 0 : index
    %1 = vector.load %arg2[%c0_1, %c0_2, %c0_3] : memref<1x128x1xf32, #tpu.memory_space<vmem>>, vector<1x128x1xf32>
    %2 = vector.shape_cast %1 : vector<1x128x1xf32> to vector<128x1xf32>
    %c0_4 = arith.constant 0 : index
    %c0_5 = arith.constant 0 : index
    %c0_6 = arith.constant 0 : index
    %3 = vector.load %arg3[%c0_4, %c0_5, %c0_6] : memref<1x128x1xf32, #tpu.memory_space<vmem>>, vector<1x128x1xf32>
    %4 = vector.shape_cast %3 : vector<1x128x1xf32> to vector<128x1xf32>
    %c0_7 = arith.constant 0 : index
    %c0_8 = arith.constant 0 : index
    %5 = vector.load %arg5[%c0_7, %c0_8] : memref<64x128xbf16, #tpu.memory_space<vmem>>, vector<64x128xbf16>
    %c0_9 = arith.constant 0 : index
    %c0_10 = arith.constant 0 : index
    %6 = vector.load %arg6[%c0_9, %c0_10] : memref<64x1xf32, #tpu.memory_space<vmem>>, vector<64x1xf32>
    %c0_11 = arith.constant 0 : index
    %c0_12 = arith.constant 0 : index
    %7 = vector.load %arg7[%c0_11, %c0_12] : memref<3x64xbf16, #tpu.memory_space<vmem>>, vector<3x64xbf16>
    %c0_13 = arith.constant 0 : index
    %c0_14 = arith.constant 0 : index
    %8 = vector.load %arg8[%c0_13, %c0_14] : memref<3x1xf32, #tpu.memory_space<vmem>>, vector<3x1xf32>
    %c0_15 = arith.constant 0 : index
    %c0_16 = arith.constant 0 : index
    %9 = vector.load %arg9[%c0_15, %c0_16] : memref<128x3xf32, #tpu.memory_space<vmem>>, vector<128x3xf32>
    %c0_17 = arith.constant 0 : index
    %c0_18 = arith.constant 0 : index
    %10 = vector.load %arg10[%c0_17, %c0_18] : memref<64x128xbf16, #tpu.memory_space<vmem>>, vector<64x128xbf16>
    %c0_19 = arith.constant 0 : index
    %c0_20 = arith.constant 0 : index
    %11 = vector.load %arg11[%c0_19, %c0_20] : memref<64x1xf32, #tpu.memory_space<vmem>>, vector<64x1xf32>
    %c0_21 = arith.constant 0 : index
    %c0_22 = arith.constant 0 : index
    %12 = vector.load %arg12[%c0_21, %c0_22] : memref<3x64xbf16, #tpu.memory_space<vmem>>, vector<3x64xbf16>
    %c0_23 = arith.constant 0 : index
    %c0_24 = arith.constant 0 : index
    %13 = vector.load %arg13[%c0_23, %c0_24] : memref<3x1xf32, #tpu.memory_space<vmem>>, vector<3x1xf32>
    %14 = vector.broadcast %2 : vector<128x1xf32> to vector<128x16xf32>
    %15 = arith.addf %0, %14 : vector<128x16xf32>
    %cst = arith.constant 0.000000e+00 : f32
    %16 = vector.broadcast %cst : f32 to vector<128x16xf32>
    %17 = arith.maximumf %15, %16 : vector<128x16xf32>
    %18 = arith.truncf %17 : vector<128x16xf32> to vector<128x16xbf16>
    %cst_25 = arith.constant dense<0.000000e+00> : vector<64x16xf32>
    %19 = tpu.matmul %5, %18, %cst_25 {dimension_numbers = #tpu.dot_dimension_numbers<[1], [0], [0], [1], [0, 0, 1, 1], [], []>} : vector<64x128xbf16>, vector<128x16xbf16>, vector<64x16xf32> -> vector<64x16xf32>
    %20 = vector.broadcast %6 : vector<64x1xf32> to vector<64x16xf32>
    %21 = arith.addf %19, %20 : vector<64x16xf32>
    %cst_26 = arith.constant 0.000000e+00 : f32
    %22 = vector.broadcast %cst_26 : f32 to vector<64x16xf32>
    %23 = arith.maximumf %21, %22 : vector<64x16xf32>
    %24 = arith.truncf %23 : vector<64x16xf32> to vector<64x16xbf16>
    %cst_27 = arith.constant dense<0.000000e+00> : vector<3x16xf32>
    %25 = tpu.matmul %7, %24, %cst_27 {dimension_numbers = #tpu.dot_dimension_numbers<[1], [0], [0], [1], [0, 0, 1, 1], [], []>} : vector<3x64xbf16>, vector<64x16xbf16>, vector<3x16xf32> -> vector<3x16xf32>
    %26 = vector.broadcast %8 : vector<3x1xf32> to vector<3x16xf32>
    %27 = arith.addf %25, %26 : vector<3x16xf32>
    %28 = vector.extract_strided_slice %9 {offsets = [0, 0], sizes = [128, 1], strides = [1, 1]} : vector<128x3xf32> to vector<128x1xf32>
    %29 = vector.extract_strided_slice %27 {offsets = [0, 0], sizes = [1, 16], strides = [1, 1]} : vector<3x16xf32> to vector<1x16xf32>
    %30 = vector.broadcast %28 : vector<128x1xf32> to vector<128x16xf32>
    %31 = vector.broadcast %29 : vector<1x16xf32> to vector<128x16xf32>
    %32 = arith.mulf %30, %31 : vector<128x16xf32>
    %33 = vector.extract_strided_slice %9 {offsets = [0, 1], sizes = [128, 1], strides = [1, 1]} : vector<128x3xf32> to vector<128x1xf32>
    %34 = vector.extract_strided_slice %27 {offsets = [1, 0], sizes = [1, 16], strides = [1, 1]} : vector<3x16xf32> to vector<1x16xf32>
    %35 = vector.broadcast %33 : vector<128x1xf32> to vector<128x16xf32>
    %36 = vector.broadcast %34 : vector<1x16xf32> to vector<128x16xf32>
    %37 = arith.mulf %35, %36 : vector<128x16xf32>
    %38 = arith.addf %32, %37 : vector<128x16xf32>
    %39 = vector.extract_strided_slice %9 {offsets = [0, 2], sizes = [128, 1], strides = [1, 1]} : vector<128x3xf32> to vector<128x1xf32>
    %40 = vector.extract_strided_slice %27 {offsets = [2, 0], sizes = [1, 16], strides = [1, 1]} : vector<3x16xf32> to vector<1x16xf32>
    %41 = vector.broadcast %39 : vector<128x1xf32> to vector<128x16xf32>
    %42 = vector.broadcast %40 : vector<1x16xf32> to vector<128x16xf32>
    %43 = arith.mulf %41, %42 : vector<128x16xf32>
    %44 = arith.addf %38, %43 : vector<128x16xf32>
    %45 = vector.broadcast %4 : vector<128x1xf32> to vector<128x16xf32>
    %46 = arith.addf %44, %45 : vector<128x16xf32>
    %cst_28 = arith.constant 0.000000e+00 : f32
    %47 = vector.broadcast %cst_28 : f32 to vector<128x16xf32>
    %48 = arith.maximumf %46, %47 : vector<128x16xf32>
    %49 = arith.truncf %48 : vector<128x16xf32> to vector<128x16xbf16>
    %cst_29 = arith.constant dense<0.000000e+00> : vector<64x16xf32>
    %50 = tpu.matmul %10, %49, %cst_29 {dimension_numbers = #tpu.dot_dimension_numbers<[1], [0], [0], [1], [0, 0, 1, 1], [], []>} : vector<64x128xbf16>, vector<128x16xbf16>, vector<64x16xf32> -> vector<64x16xf32>
    %51 = vector.broadcast %11 : vector<64x1xf32> to vector<64x16xf32>
    %52 = arith.addf %50, %51 : vector<64x16xf32>
    %cst_30 = arith.constant 0.000000e+00 : f32
    %53 = vector.broadcast %cst_30 : f32 to vector<64x16xf32>
    %54 = arith.maximumf %52, %53 : vector<64x16xf32>
    %55 = arith.truncf %54 : vector<64x16xf32> to vector<64x16xbf16>
    %cst_31 = arith.constant dense<0.000000e+00> : vector<3x16xf32>
    %56 = tpu.matmul %12, %55, %cst_31 {dimension_numbers = #tpu.dot_dimension_numbers<[1], [0], [0], [1], [0, 0, 1, 1], [], []>} : vector<3x64xbf16>, vector<64x16xbf16>, vector<3x16xf32> -> vector<3x16xf32>
    %57 = vector.broadcast %13 : vector<3x1xf32> to vector<3x16xf32>
    %58 = arith.addf %56, %57 : vector<3x16xf32>
    %c0_32 = arith.constant 0 : index
    %c0_33 = arith.constant 0 : index
    %c0_34 = arith.constant 0 : index
    %59 = vector.load %arg14[%c0_32, %c0_33, %c0_34] : memref<1x3x16xf32, #tpu.memory_space<vmem>>, vector<1x3x16xf32>
    %60 = vector.shape_cast %59 : vector<1x3x16xf32> to vector<3x16xf32>
    %61 = vector.shape_cast %58 : vector<3x16xf32> to vector<1x3x16xf32>
    tpu.vector_store %arg14[%c0_32, %c0_33, %c0_34], %61 {strides = array<i32>} : memref<1x3x16xf32, #tpu.memory_space<vmem>>, vector<1x3x16xf32>,
    return
  }
  func.func @transform_0(%arg0: i32, %arg1: i32) -> (i32, i32, i32) {
    %c0_i32 = arith.constant 0 : i32
    %c0_i32_0 = arith.constant 0 : i32
    %c0_i32_1 = arith.constant 0 : i32
    return %arg0, %c0_i32, %c0_i32_0 : i32, i32, i32
  }
  func.func @transform_1(%arg0: i32, %arg1: i32) -> (i32, i32, i32) {
    %c0_i32 = arith.constant 0 : i32
    %c0_i32_0 = arith.constant 0 : i32
    %c0_i32_1 = arith.constant 0 : i32
    return %arg0, %c0_i32, %c0_i32_0 : i32, i32, i32
  }
  func.func @transform_2(%arg0: i32, %arg1: i32) -> (i32, i32) {
    %c0_i32 = arith.constant 0 : i32
    %c0_i32_0 = arith.constant 0 : i32
    return %c0_i32, %arg1 : i32, i32
  }
  func.func @transform_3(%arg0: i32, %arg1: i32) -> (i32, i32) {
    %c0_i32 = arith.constant 0 : i32
    %c0_i32_0 = arith.constant 0 : i32
    %c0_i32_1 = arith.constant 0 : i32
    return %c0_i32, %c0_i32_0 : i32, i32
  }
  func.func @transform_4(%arg0: i32, %arg1: i32) -> (i32, i32) {
    %c0_i32 = arith.constant 0 : i32
    %c0_i32_0 = arith.constant 0 : i32
    %c0_i32_1 = arith.constant 0 : i32
    return %c0_i32, %c0_i32_0 : i32, i32
  }
  func.func @transform_5(%arg0: i32, %arg1: i32) -> (i32, i32) {
    %c0_i32 = arith.constant 0 : i32
    %c0_i32_0 = arith.constant 0 : i32
    %c0_i32_1 = arith.constant 0 : i32
    return %c0_i32, %c0_i32_0 : i32, i32
  }
  func.func @transform_6(%arg0: i32, %arg1: i32) -> (i32, i32) {
    %c0_i32 = arith.constant 0 : i32
    %c0_i32_0 = arith.constant 0 : i32
    %c0_i32_1 = arith.constant 0 : i32
    return %c0_i32, %c0_i32_0 : i32, i32
  }
  func.func @transform_7(%arg0: i32, %arg1: i32) -> (i32, i32) {
    %c0_i32 = arith.constant 0 : i32
    %c0_i32_0 = arith.constant 0 : i32
    %c0_i32_1 = arith.constant 0 : i32
    return %c0_i32, %c0_i32_0 : i32, i32
  }
  func.func @transform_8(%arg0: i32, %arg1: i32) -> (i32, i32) {
    %c0_i32 = arith.constant 0 : i32
    %c0_i32_0 = arith.constant 0 : i32
    %c0_i32_1 = arith.constant 0 : i32
    return %c0_i32, %c0_i32_0 : i32, i32
  }
  func.func @transform_9(%arg0: i32, %arg1: i32) -> (i32, i32) {
    %c0_i32 = arith.constant 0 : i32
    %c0_i32_0 = arith.constant 0 : i32
    %c0_i32_1 = arith.constant 0 : i32
    return %c0_i32, %c0_i32_0 : i32, i32
  }
  func.func @transform_10(%arg0: i32, %arg1: i32) -> (i32, i32) {
    %c0_i32 = arith.constant 0 : i32
    %c0_i32_0 = arith.constant 0 : i32
    %c0_i32_1 = arith.constant 0 : i32
    return %c0_i32, %c0_i32_0 : i32, i32
  }
  func.func @transform_11(%arg0: i32, %arg1: i32) -> (i32, i32) {
    %c0_i32 = arith.constant 0 : i32
    %c0_i32_0 = arith.constant 0 : i32
    %c0_i32_1 = arith.constant 0 : i32
    return %c0_i32, %c0_i32_0 : i32, i32
  }
  func.func @transform_12(%arg0: i32, %arg1: i32) -> (i32, i32, i32) {
    %c0_i32 = arith.constant 0 : i32
    %c0_i32_0 = arith.constant 0 : i32
    return %arg0, %c0_i32, %arg1 : i32, i32, i32
  }
}

</mosaic_0001>

<bundles_post_ra>
// kernel: tpu_custom_call.1
= control target key start
LH: loop header
LB: loop body
LE: loop exit
PB: predicated region body
PF: predicated region fallthrough
CT: control target
= control target key end

     0   :  { %s1880_s21 = smov 0   ;;  %s1882_s22 = smov 0   ;;  %s2418_s0 = inlined_call_operand.vmem [shape: f32[2,128,1], index: 0, kind: input, shape index: {}]   ;;  %s2419_s1 = inlined_call_operand.vmem [shape: f32[2,128,1], index: 1, kind: input, shape index: {}]   ;;  %s2420_s2 = inlined_call_operand.vmem [shape: f32[128,16], index: 2, kind: input, shape index: {}]   ;;  %s2421_s3 = inlined_call_operand.vmem [shape: bf16[64,128], index: 3, kind: input, shape index: {}]   ;;  %s2422_s4 = inlined_call_operand.vmem [shape: f32[64,1], index: 4, kind: input, shape index: {}]   ;;  %s2423_s5 = inlined_call_operand.vmem [shape: bf16[3,64], index: 5, kind: input, shape index: {}]   ;;  %s2424_s6 = inlined_call_operand.vmem [shape: f32[3,1], index: 6, kind: input, shape index: {}]   ;;  %s2425_s7 = inlined_call_operand.vmem [shape: f32[128,3], index: 7, kind: input, shape index: {}]   ;;  %s2426_s8 = inlined_call_operand.vmem [shape: bf16[64,128], index: 8, kind: input, shape index: {}]   ;;  %s2427_s9 = inlined_call_operand.vmem [shape: f32[64,1], index: 9, kind: input, shape index: {}]   ;;  %s2428_s10 = inlined_call_operand.vmem [shape: bf16[3,64], index: 10, kind: input, shape index: {}]   ;;  %s2429_s11 = inlined_call_operand.vmem [shape: f32[3,1], index: 11, kind: input, shape index: {}]   ;;  %s2430_s12 = inlined_call_operand.vmem [shape: f32[2,3,16], index: 12, kind: output, shape index: {}]  }
   0x1   :  { %s1884_s23 = smov 0  }
   0x2 LB: > { %s34_s24 = sadd.s32 1, %s1804_s22  ;;  %p1595_p0 = scmp.ge.s32.totalorder %s1808_s23, 1  ;;  %s1808_s23 = sphi %s1884_s23, %s22_s23   ;;  %s1804_s22 = sphi %s1882_s22, %s2453_s22   ;;  %s1800_s21 = sphi %s1880_s21, %s2452_s21  }
   0x3   : > { %p36_p1 = scmp.ge.s32.totalorder %s34_s24, 2  ;;  %p395_p2 = scmp.lt.s32.totalorder %s1808_s23, 3 }
   0x5   : > { %s2455_s24 = smov (%p36_p1, %s34_s24), 0  ;;  %p396_p3 = pnand %p1595_p0, %p395_p2 }
   0x7   : > { %399 = sbr.rel (%p396_p3) target bundleno = 1139 (0x473), region = 68 }
   0xe   : > { %p448_p4 = scmp.lt.s32.totalorder %s1800_s21, 1  ;;  %v1810_v0 = vmov 0   ;;  %v527_v17 = vld [vmem:[%s2422_s4 + $0x8] sm:$0xff]  ;;  %v526_v18 = vld [vmem:[%s2422_s4] sm:$0xff]  ;;  %v529_v19 = vld [vmem:[%s2422_s4 + $0x18] sm:$0xff]  ;;  %v1811_v28 = vmov 1  }
   0xf   : > { %1751 = vset.pattern.permute.xlu1 %v1810_v0  ;;  %1750 = vset.pattern.permute.xlu0 %v1810_v0  ;;  %v528_v20 = vld [vmem:[%s2422_s4 + $0x10] sm:$0xff]  ;;  %v531_v21 = vld [vmem:[%s2422_s4 + $0x28] sm:$0xff]  ;;  %v530_v22 = vld [vmem:[%s2422_s4 + $0x20] sm:$0xff]  ;;  %v1812_v30 = vmov 2   ;;  %vm1814_vm0 = vmmov 0   ;;  %vm836_vm1 = vcmask 523264  }
  0x10   : > { %s2457_s21 = smov (!%p448_p4, %s1800_s21), 1  ;;  %v1778_v23 = vld [vmem:[%s2421_s3] sm:$0xff]   ;;  %v533_v24 = vld [vmem:[%s2422_s4 + $0x38] sm:$0xff]  ;;  %v532_v25 = vld [vmem:[%s2422_s4 + $0x30] sm:$0xff]  ;;  %vm1489_vm2 = vcmask 124928  }
  0x11   : > { %s1613_s25 = sshll.u32 %s2457_s21, 7  ;;  %1665 = vmatprep.mubr.bf16.mxu0 %v1778_v23  ;;  %v536_v26 = vld [vmem:[%s2425_s7] sm:$0xff]  ;;  %v1941_v27 = vld [vmem:[%s2425_s7 + $0x8] sm:$0xff]  ;;  %v539_v29 = vld [vmem:[%s2425_s7 + $0x18] sm:$0xff] }
  0x12   : > { %s452_s28 = scalar_lea.vmem %s2418_s0, %s1613_s25  ;;  %v1953_v31 = vld [vmem:[%s2425_s7 + $0x28] sm:$0xff]  ;;  %v1959_v32 = vld [vmem:[%s2425_s7 + $0x38] sm:$0xff]  ;;  %v1973_v34 = vld [vmem:[%s2425_s7 + $0x10] sm:$0xff]  ;;  %s2001_s30 = scalar_lea.vmem %s2419_s1, %s1613_s25 }
  0x13   : > { %v488_v1 = vld [vmem:[%s452_s28 + $0x10] sm:$0xff]  ;;  %v486_v2 = vld [vmem:[%s452_s28] sm:$0xff]  ;;  %v489_v3 = vld [vmem:[%s452_s28 + $0x18] sm:$0xff]  ;;  %s1600_s25 = sshll.u32 %s2457_s21, 2 }
  0x14   : > { %582 = vperm.xlu1 %1751, %v488_v1   ;;  %572 = vperm.xlu0 %1750, %v486_v2   ;;  %v487_v4 = vld [vmem:[%s452_s28 + $0x8] sm:$0xff]  ;;  %v490_v6 = vld [vmem:[%s452_s28 + $0x20] sm:$0xff]  ;;  %v493_v7 = vld [vmem:[%s452_s28 + $0x38] sm:$0xff]  ;;  %s468_s17 = scalar_lea.vmem %s2430_s12, %s1600_s25 }
  0x15   : > { %v491_v5 = vld [vmem:[%s452_s28 + $0x28] sm:$0xff]  ;;  %v492_v8 = vld [vmem:[%s452_s28 + $0x30] sm:$0xff]  ;;  %v494_v10 = vld [vmem:[%s452_s28 + $0x40] sm:$0xff] }
  0x16   : > { %v495_v9 = vld [vmem:[%s452_s28 + $0x48] sm:$0xff]  ;;  %v497_v11 = vld [vmem:[%s452_s28 + $0x58] sm:$0xff]  ;;  %v496_v12 = vld [vmem:[%s452_s28 + $0x50] sm:$0xff] }
  0x17   : > { %v499_v13 = vld [vmem:[%s452_s28 + $0x68] sm:$0xff]  ;;  %v498_v14 = vld [vmem:[%s452_s28 + $0x60] sm:$0xff]  ;;  %v501_v15 = vld [vmem:[%s452_s28 + $0x78] sm:$0xff] }
  0x18   : > { %587 = vperm.xlu1 %1751, %v489_v3   ;;  %577 = vperm.xlu0 %1750, %v487_v4   ;;  %v500_v16 = vld [vmem:[%s452_s28 + $0x70] sm:$0xff]  ;;  %v1966_v33 = vld [vmem:[%s2425_s7 + $0x48] sm:$0xff]  ;;  %v1978_v35 = vld [vmem:[%s2425_s7 + $0x58] sm:$0xff] }
  0x19   : > { %v1986_v36 = vld [vmem:[%s2425_s7 + $0x68] sm:$0xff]  ;;  %v1994_v37 = vld [vmem:[%s2425_s7 + $0x78] sm:$0xff]  ;;  %v540_v39 = vld [vmem:[%s2425_s7 + $0x20] sm:$0xff] }
  0x1a   : > { %v503_v38 = vld [vmem:[%s2001_s30 + $0x8] sm:$0xff]  ;;  %v505_v40 = vld [vmem:[%s2001_s30 + $0x18] sm:$0xff]  ;;  %v472_v41 = vld [vmem:[%s2420_s2 + $0x10] sm:$0xff] }
  0x1b   : > { %v470_v43 = vld [vmem:[%s2420_s2] sm:$0xff]  ;;  %v473_v45 = vld [vmem:[%s2420_s2 + $0x18] sm:$0xff]  ;;  %v471_v46 = vld [vmem:[%s2420_s2 + $0x8] sm:$0xff] }
  0x1c   : > { %597 = vperm.xlu1 %1751, %v491_v5   ;;  %592 = vperm.xlu0 %1750, %v490_v6   ;;  %v475_v53 = vld [vmem:[%s2420_s2 + $0x28] sm:$0xff]  ;;  %v474_v54 = vld [vmem:[%s2420_s2 + $0x20] sm:$0xff]  ;;  %v477_v1 = vld [vmem:[%s2420_s2 + $0x38] sm:$0xff] }
  0x1d   : > { %v476_v2 = vld [vmem:[%s2420_s2 + $0x30] sm:$0xff] }
  0x20   : > { %607 = vperm.xlu1 %1751, %v493_v7   ;;  %602 = vperm.xlu0 %1750, %v492_v8  }
  0x24   : > { %617 = vperm.xlu1 %1751, %v495_v9   ;;  %612 = vperm.xlu0 %1750, %v494_v10   ;;  %v479_v10 = vld [vmem:[%s2420_s2 + $0x48] sm:$0xff] }
  0x28   : > { %627 = vperm.xlu1 %1751, %v497_v11   ;;  %622 = vperm.xlu0 %1750, %v496_v12   ;;  %v478_v11 = vld [vmem:[%s2420_s2 + $0x40] sm:$0xff] }
  0x2c   : > { %637 = vperm.xlu1 %1751, %v499_v13   ;;  %632 = vperm.xlu0 %1750, %v498_v14  }
  0x30   : > { %647 = vperm.xlu1 %1751, %v501_v15   ;;  %642 = vperm.xlu0 %1750, %v500_v16  }
  0x34   : > { %697 = vperm.xlu1 %1751, %v527_v17   ;;  %692 = vperm.xlu0 %1750, %v526_v18  }
  0x38   : > { %707 = vperm.xlu1 %1751, %v529_v19   ;;  %702 = vperm.xlu0 %1750, %v528_v20   ;;  %v481_v19 = vld [vmem:[%s2420_s2 + $0x58] sm:$0xff]  ;;  %v480_v20 = vld [vmem:[%s2420_s2 + $0x50] sm:$0xff] }
  0x3c   : > { %717 = vperm.xlu1 %1751, %v531_v21   ;;  %712 = vperm.xlu0 %1750, %v530_v22  }
  0x40   : > { %727 = vperm.xlu1 %1751, %v533_v24   ;;  %722 = vperm.xlu0 %1750, %v532_v25  }
  0x44   : > { %882 = vperm.xlu1 %1751, %v536_v26   ;;  %1753 = vset.pattern.permute.xlu0 %v1811_v28 }
  0x45   : > { %985 = vperm.xlu0 %1753, %v1941_v27  }
  0x48   : > { %1752 = vset.pattern.permute.xlu1 %v1811_v28 }
  0x49   : > { %981 = vperm.xlu1 %1752, %v536_v26   ;;  %993 = vperm.xlu0 %1753, %v539_v29  }
  0x4d   : > { %1754 = vset.pattern.permute.xlu1 %v1812_v30  ;;  %1001 = vperm.xlu0 %1753, %v1953_v31  }
  0x4e   : > { %1081 = vperm.xlu1 %1754, %v536_v26  }
  0x51   : > { %1009 = vperm.xlu0 %1753, %v1959_v32  }
  0x52   : > { %1085 = vperm.xlu1 %1754, %v1941_v27  }
  0x55   : > { %1017 = vperm.xlu0 %1753, %v1966_v33  }
  0x56   : > { %1755 = vset.pattern.permute.xlu1 %v1810_v0 }
  0x57   : > { %897 = vperm.xlu1 %1755, %v539_v29  }
  0x59   : > { %1025 = vperm.xlu0 %1753, %v1978_v35  }
  0x5b   : > { %1756 = vset.pattern.permute.xlu1 %v1811_v28 }
  0x5c   : > { %989 = vperm.xlu1 %1756, %v1973_v34  }
  0x5d   : > { %1033 = vperm.xlu0 %1753, %v1986_v36  }
  0x60   : > { %1757 = vset.pattern.permute.xlu1 %v1812_v30 }
  0x61   : > { %1089 = vperm.xlu1 %1757, %v1973_v34   ;;  %1041 = vperm.xlu0 %1753, %v1994_v37  }
  0x65   : > { %1093 = vperm.xlu1 %1757, %v539_v29   ;;  %1775 = vset.pattern.permute.xlu0 %v1810_v0 }
  0x69   : > { %1758 = vset.pattern.permute.xlu1 %v1810_v0 }
  0x6a   : > { %1187 = vperm.xlu1 %1758, %v503_v38   ;;  %v483_v38 = vld [vmem:[%s2420_s2 + $0x68] sm:$0xff] }
  0x6e   : > { %902 = vperm.xlu1 %1758, %v540_v39  }
  0x72   : > { %1759 = vset.pattern.permute.xlu1 %v1811_v28 }
  0x73   : > { %997 = vperm.xlu1 %1759, %v540_v39  }
  0x77   : > { %1760 = vset.pattern.permute.xlu1 %v1812_v30 }
  0x78   : > { %1097 = vperm.xlu1 %1760, %v540_v39   ;;  %v482_v39 = vld [vmem:[%s2420_s2 + $0x60] sm:$0xff] }
  0x7c   : > { %1101 = vperm.xlu1 %1760, %v1953_v31  }
  0x80   : > { %1761 = vset.pattern.permute.xlu1 %v1810_v0 }
  0x81   : > { %1197 = vperm.xlu1 %1761, %v505_v40  }
  0x93   : > { %v583_v42 = vpop.permute.xlu1 %582  ;;  %v573_v44 = vpop.permute.xlu0 %572 }
  0x94   : > { %v652_v47 = vadd.f32 %v583_v42, %v472_v41  ;;  %v650_v48 = vadd.f32 %v573_v44, %v470_v43 }
  0x96   : > { %v668_v55 = vmax.f32 %v652_v47, 0.0  ;;  %v666_v56 = vmax.f32 %v650_v48, 0.0  ;;  %v485_v47 = vld [vmem:[%s2420_s2 + $0x78] sm:$0xff]  ;;  %v484_v48 = vld [vmem:[%s2420_s2 + $0x70] sm:$0xff] }
  0x97   : > { %v588_v49 = vpop.permute.xlu1 %587  ;;  %v578_v50 = vpop.permute.xlu0 %577 }
  0x98   : > { %v653_v51 = vadd.f32 %v588_v49, %v473_v45  ;;  %v651_v52 = vadd.f32 %v578_v50, %v471_v46 }
  0x9a   : > { %v669_v57 = vmax.f32 %v653_v51, 0.0  ;;  %v667_v58 = vmax.f32 %v651_v52, 0.0 }
  0x9b   : > { %v598_v59 = vpop.permute.xlu1 %597  ;;  %v593_v60 = vpop.permute.xlu0 %592 }
  0x9c   : > { %v655_v61 = vadd.f32 %v598_v59, %v475_v53  ;;  %v654_v62 = vadd.f32 %v593_v60, %v474_v54  ;;  %v682_v63 = vpack.c.bf16 %v667_v58, %v666_v56  ;;  %v683_v5 = vpack.c.bf16 %v669_v57, %v668_v55  ;;  %v1779_v60 = vld [vmem:[%s2421_s3 + $0x8] sm:$0xff]  }
  0x9e   : > { %v671_v3 = vmax.f32 %v655_v61, 0.0  ;;  %v670_v4 = vmax.f32 %v654_v62, 0.0  ;;  %1649 = vmatprep.subr.bf16.mxu0 %v682_v63  ;;  %v1780_v61 = vld [vmem:[%s2421_s3 + $0x10] sm:$0xff]   ;;  %v1781_v62 = vld [vmem:[%s2421_s3 + $0x18] sm:$0xff]  }
  0x9f   : > { %v608_v6 = vpop.permute.xlu1 %607  ;;  %1650 = vmatpush3.bf16.msra.mxu0 %v682_v63  ;;  %v603_v7 = vpop.permute.xlu0 %602  ;;  %v535_v63 = vld [vmem:[%s2424_s6] sm:$0x7] }
  0xa0   : > { %v657_v8 = vadd.f32 %v608_v6, %v477_v1  ;;  %v656_v9 = vadd.f32 %v603_v7, %v476_v2  ;;  %1651 = vmatprep.subr.bf16.mxu0 %v683_v5  ;;  %v684_v12 = vpack.c.bf16 %v671_v3, %v670_v4  ;;  %833 = vperm.xlu0 %1775, %v535_v63   ;;  %v542_v1 = vld [vmem:[%s2425_s7 + $0x30] sm:$0xff]  ;;  %v2431_v2 = vmov 0.0   ;;  %v502_v3 = vld [vmem:[%s2001_s30] sm:$0xff]  ;;  %v509_v6 = vld [vmem:[%s2001_s30 + $0x38] sm:$0xff] }
  0xa1   : > { %912 = vperm.xlu1 %1761, %v542_v1   ;;  %1673 = vmatprep.subr.bf16.mxu1 %v2431_v2  ;;  %v504_v4 = vld [vmem:[%s2001_s30 + $0x10] sm:$0xff] }
  0xa2   : > { %v673_v13 = vmax.f32 %v657_v8, 0.0  ;;  %v672_v14 = vmax.f32 %v656_v9, 0.0  ;;  %1681 = vmatprep.mubr.msk.bf16.mxu1 %vm1814_vm0, %v2431_v2  ;;  %v546_v7 = vld [vmem:[%s2425_s7 + $0x50] sm:$0xff]  ;;  %v517_v9 = vld [vmem:[%s2001_s30 + $0x78] sm:$0xff] }
  0xa3   : > { %v618_v15 = vpop.permute.xlu1 %617  ;;  %1652 = vmatpush3.bf16.msra.mxu0 %v683_v5  ;;  %v613_v16 = vpop.permute.xlu0 %612  ;;  %v508_v5 = vld [vmem:[%s2001_s30 + $0x30] sm:$0xff] }
  0xa4   : > { %v659_v17 = vadd.f32 %v618_v15, %v479_v10  ;;  %v658_v18 = vadd.f32 %v613_v16, %v478_v11  ;;  %1653 = vmatprep.subr.bf16.mxu0 %v684_v12  ;;  %v685_v21 = vpack.c.bf16 %v673_v13, %v672_v14  ;;  %887 = vperm.xlu0 %1775, %v1941_v27   ;;  %v507_v27 = vld [vmem:[%s2001_s30 + $0x28] sm:$0xff]  ;;  %v512_v8 = vld [vmem:[%s2001_s30 + $0x50] sm:$0xff]  ;;  %v567_v14 = vld [vmem:[%s2427_s9 + $0x38] sm:$0xff] }
  0xa5   : > { %1762 = vset.pattern.permute.xlu1 %v1811_v28  ;;  %v511_v10 = vld [vmem:[%s2001_s30 + $0x48] sm:$0xff]  ;;  %v513_v15 = vld [vmem:[%s2001_s30 + $0x58] sm:$0xff]  ;;  %v550_v16 = vld [vmem:[%s2425_s7 + $0x70] sm:$0xff] }
  0xa6   : > { %v675_v22 = vmax.f32 %v659_v17, 0.0  ;;  %v674_v23 = vmax.f32 %v658_v18, 0.0  ;;  %1005 = vperm.xlu1 %1762, %v542_v1   ;;  %v561_v11 = vld [vmem:[%s2427_s9 + $0x8] sm:$0xff] }
  0xa7   : > { %v628_v24 = vpop.permute.xlu1 %627  ;;  %1654 = vmatpush3.bf16.msra.mxu0 %v684_v12  ;;  %v623_v25 = vpop.permute.xlu0 %622  ;;  %v548_v12 = vld [vmem:[%s2425_s7 + $0x60] sm:$0xff]  ;;  %v565_v13 = vld [vmem:[%s2427_s9 + $0x28] sm:$0xff] }
  0xa8   : > { %v661_v26 = vadd.f32 %v628_v24, %v481_v19  ;;  %v660_v29 = vadd.f32 %v623_v25, %v480_v20  ;;  %1655 = vmatprep.subr.bf16.mxu0 %v685_v21  ;;  %v686_v40 = vpack.c.bf16 %v675_v22, %v674_v23  ;;  %892 = vperm.xlu0 %1775, %v1973_v34   ;;  %v544_v34 = vld [vmem:[%s2425_s7 + $0x40] sm:$0xff]  ;;  %v515_v17 = vld [vmem:[%s2001_s30 + $0x68] sm:$0xff] }
  0xa9   : > { %v560_v20 = vld [vmem:[%s2427_s9] sm:$0xff] }
  0xaa   : > { %v677_v41 = vmax.f32 %v661_v26, 0.0  ;;  %v676_v42 = vmax.f32 %v660_v29, 0.0  ;;  %1763 = vset.pattern.permute.xlu1 %v1812_v30 }
  0xab   : > { %v638_v43 = vpop.permute.xlu1 %637  ;;  %1656 = vmatpush3.bf16.msra.mxu0 %v685_v21  ;;  %v633_v44 = vpop.permute.xlu0 %632  ;;  %1105 = vperm.xlu1 %1763, %v542_v1  }
  0xac   : > { %v663_v45 = vadd.f32 %v638_v43, %v483_v38  ;;  %v662_v46 = vadd.f32 %v633_v44, %v482_v39  ;;  %1657 = vmatprep.subr.bf16.mxu0 %v686_v40  ;;  %v687_v49 = vpack.c.bf16 %v677_v41, %v676_v42  ;;  %1182 = vperm.xlu0 %1775, %v502_v3   ;;  %v566_v41 = vld [vmem:[%s2427_s9 + $0x30] sm:$0xff]  ;;  %v534_v3 = vld [vmem:[%s2423_s5] sm:$0x3] }
  0xae   : > { %v679_v50 = vmax.f32 %v663_v45, 0.0  ;;  %v678_v51 = vmax.f32 %v662_v46, 0.0 }
  0xaf   : > { %v648_v52 = vpop.permute.xlu1 %647  ;;  %1658 = vmatpush3.bf16.msra.mxu0 %v686_v40  ;;  %v643_v53 = vpop.permute.xlu0 %642  ;;  %1109 = vperm.xlu1 %1763, %v1959_v32  }
  0xb0   : > { %v665_v54 = vadd.f32 %v648_v52, %v485_v47  ;;  %v664_v55 = vadd.f32 %v643_v53, %v484_v48  ;;  %1659 = vmatprep.subr.bf16.mxu0 %v687_v49  ;;  %v688_v56 = vpack.c.bf16 %v679_v50, %v678_v51  ;;  %907 = vperm.xlu0 %1775, %v1953_v31   ;;  %v506_v31 = vld [vmem:[%s2001_s30 + $0x20] sm:$0xff] }
  0xb1   : > { %v569_v50 = vld [vmem:[%s2429_s11] sm:$0x7] }
  0xb2   : > { %v681_v57 = vmax.f32 %v665_v54, 0.0  ;;  %v680_v58 = vmax.f32 %v664_v55, 0.0 }
  0xb3   : > { %1660 = vmatpush3.bf16.msra.mxu0 %v687_v49  ;;  %1764 = vset.pattern.permute.xlu1 %v1810_v0  ;;  %v693_v18 = vpop.permute.xlu0 %692  ;;  %v698_v19 = vpop.permute.xlu1 %697 }
  0xb4   : > { %1661 = vmatprep.subr.bf16.mxu0 %v688_v56  ;;  %v689_v59 = vpack.c.bf16 %v681_v57, %v680_v58  ;;  %1207 = vperm.xlu1 %1764, %v507_v27  }
  0xb5   : > { %1192 = vperm.xlu0 %1775, %v504_v4  }
  0xb7   : > { %1662 = vmatpush3.bf16.msra.mxu0 %v688_v56  ;;  %v708_v21 = vpop.permute.xlu1 %707 }
  0xb8   : > { %1663 = vmatprep.subr.bf16.mxu0 %v689_v59  ;;  %922 = vperm.xlu1 %1764, %v544_v34  }
  0xb9   : > { %917 = vperm.xlu0 %1775, %v1959_v32   ;;  %v510_v32 = vld [vmem:[%s2001_s30 + $0x40] sm:$0xff] }
  0xbb   : > { %1664 = vmatpush3.bf16.msra.mxu0 %v689_v59  ;;  %v718_v39 = vpop.permute.xlu1 %717 }
  0xbc   : > { %1709 = vmatprep.subr.bf16.mxu0 %v2431_v2  ;;  %1765 = vset.pattern.permute.xlu1 %v1811_v28 }
  0xbd   : > { %1202 = vperm.xlu0 %1775, %v506_v31   ;;  %1013 = vperm.xlu1 %1765, %v544_v34  }
  0xbe   : > { %1666 = vmatmul.mubr.bf16.vlgmr.msra.gmra.mrb[0].mxu0 %v1779_v60 }
  0xbf   : > { %1669 = vmatprep.mubr.bf16.mxu0 %v1780_v61  ;;  %v728_v53 = vpop.permute.xlu1 %727 }
  0xc1   : > { %927 = vperm.xlu0 %1775, %v1966_v33   ;;  %1766 = vset.pattern.permute.xlu1 %v1812_v30 }
  0xc2   : > { %1113 = vperm.xlu1 %1766, %v544_v34  }
  0xc3   : > { %v2170_v27 = vpop.permute.xlu1 %882 }
  0xc5   : > { %1212 = vperm.xlu0 %1775, %v508_v5  }
  0xc6   : > { %1670 = vmatmul.mubr.bf16.gmra.mrb[4].mxu0 %v1781_v62  ;;  %1117 = vperm.xlu1 %1766, %v1966_v33   ;;  %v514_v33 = vld [vmem:[%s2001_s30 + $0x60] sm:$0xff] }
  0xc7   : > { %1717 = vmatprep.mubr.msk.bf16.mxu0 %vm1814_vm0, %v2431_v2 }
  0xc8   : > { %v2172_v4 = vpop.permute.xlu1 %981 }
  0xc9   : > { %937 = vperm.xlu0 %1775, %v1978_v35  }
  0xca   : > { %1767 = vset.pattern.permute.xlu1 %v1810_v0 }
  0xcb   : > { %1217 = vperm.xlu1 %1767, %v509_v6  }
  0xcd   : > { %1222 = vperm.xlu0 %1775, %v510_v32   ;;  %v2174_v34 = vpop.permute.xlu1 %1081 }
  0xcf   : > { %932 = vperm.xlu1 %1767, %v546_v7  }
  0xd1   : > { %947 = vperm.xlu0 %1775, %v1986_v36   ;;  %v2176_v31 = vpop.permute.xlu1 %1085 }
  0xd3   : > { %1768 = vset.pattern.permute.xlu1 %v1811_v28 }
  0xd4   : > { %1021 = vperm.xlu1 %1768, %v546_v7  }
  0xd5   : > { %1232 = vperm.xlu0 %1775, %v512_v8  }
  0xd6   : > { %v2178_v5 = vpop.permute.xlu1 %897 }
  0xd8   : > { %1769 = vset.pattern.permute.xlu1 %v1812_v30 }
  0xd9   : > { %957 = vperm.xlu0 %1775, %v1994_v37   ;;  %1121 = vperm.xlu1 %1769, %v546_v7  }
  0xdb   : > { %v2180_v6 = vpop.permute.xlu1 %989 }
  0xdd   : > { %1242 = vperm.xlu0 %1775, %v514_v33   ;;  %1125 = vperm.xlu1 %1769, %v1978_v35   ;;  %v563_v35 = vld [vmem:[%s2427_s9 + $0x18] sm:$0xff] }
  0xe0   : > { %v2182_v32 = vpop.permute.xlu1 %1089 }
  0xe1   : > { %1257 = vperm.xlu0 %1775, %v517_v9   ;;  %1770 = vset.pattern.permute.xlu1 %v1810_v0 }
  0xe2   : > { %1227 = vperm.xlu1 %1770, %v511_v10  }
  0xe4   : > { %v2184_v7 = vpop.permute.xlu1 %1093 }
  0xe5   : > { %1307 = vperm.xlu0 %1775, %v561_v11  }
  0xe6   : > { %942 = vperm.xlu1 %1770, %v548_v12  }
  0xe9   : > { %1317 = vperm.xlu0 %1775, %v563_v35   ;;  %v2186_v8 = vpop.permute.xlu1 %1187 }
  0xea   : > { %1771 = vset.pattern.permute.xlu1 %v1811_v28 }
  0xeb   : > { %1029 = vperm.xlu1 %1771, %v548_v12  }
  0xed   : > { %1327 = vperm.xlu0 %1775, %v565_v13   ;;  %v2188_v33 = vpop.permute.xlu1 %902 }
  0xef   : > { %1772 = vset.pattern.permute.xlu1 %v1812_v30 }
  0xf0   : > { %1129 = vperm.xlu1 %1772, %v548_v12  }
  0xf1   : > { %1337 = vperm.xlu0 %1775, %v567_v14  }
  0xf2   : > { %v2190_v9 = vpop.permute.xlu1 %997 }
  0xf4   : > { %1133 = vperm.xlu1 %1772, %v1986_v36   ;;  %v516_v36 = vld [vmem:[%s2001_s30 + $0x70] sm:$0xff] }
  0xf7   : > { %v2192_v10 = vpop.permute.xlu1 %1097 }
  0xf8   : > { %1773 = vset.pattern.permute.xlu1 %v1810_v0 }
  0xf9   : > { %1237 = vperm.xlu1 %1773, %v513_v15  }
  0xfb   : > { %v2194_v11 = vpop.permute.xlu1 %1101 }
  0xfd   : > { %952 = vperm.xlu1 %1773, %v550_v16  }
 0x100   : > { %v2196_v12 = vpop.permute.xlu1 %1197 }
 0x101   : > { %1774 = vset.pattern.permute.xlu1 %v1811_v28  ;;  %v703_v28 = vpop.permute.xlu0 %702 }
 0x102   : > { %1037 = vperm.xlu1 %1774, %v550_v16  }
 0x105   : > { %v713_v24 = vpop.permute.xlu0 %712 }
 0x106   : > { %1776 = vset.pattern.permute.xlu1 %v1812_v30  ;;  %v562_v30 = vld [vmem:[%s2427_s9 + $0x10] sm:$0xff] }
 0x107   : > { %1137 = vperm.xlu1 %1776, %v550_v16  }
 0x109   : > { %v723_v47 = vpop.permute.xlu0 %722 }
 0x10b   : > { %1141 = vperm.xlu1 %1776, %v1994_v37  }
 0x10d   : > { %v2200_v13 = vpop.permute.xlu0 %985 }
 0x10f   : > { %1777 = vset.pattern.permute.xlu1 %v1810_v0  ;;  %v564_v0 = vld [vmem:[%s2427_s9 + $0x20] sm:$0xff] }
 0x110   : > { %1247 = vperm.xlu1 %1777, %v515_v17  }
 0x111   : > { %v2204_v15 = vpop.permute.xlu0 %993 }
 0x114   : > { %1252 = vperm.xlu1 %1777, %v516_v36  }
 0x115   : > { %v2208_v17 = vpop.permute.xlu0 %1001 }
 0x118   : > { %1302 = vperm.xlu1 %1777, %v560_v20  }
 0x11c   : > { %1312 = vperm.xlu1 %1777, %v562_v30  }
 0x120   : > { %1322 = vperm.xlu1 %1777, %v564_v0   ;;  %v2198_v35 = vpop.permute.xlu1 %912 }
 0x124   : > { %1332 = vperm.xlu1 %1777, %v566_v41  }
 0x125   : > { %v2202_v14 = vpop.permute.xlu1 %1005 }
 0x128   : > { %1443 = vperm.xlu1 %1777, %v569_v50  }
 0x12a   : > { %v2206_v16 = vpop.permute.xlu1 %1105 }
 0x12e   : > { %v2210_v36 = vpop.permute.xlu1 %1109 }
 0x191   : > { %v1667_v37 = vpop.f32.mrb[0].mxu0 }
 0x192   : > { %v797_v22 = vadd.f32 %v1667_v37, %v703_v28  ;;  %v788_v23 = vpop.f32.mrb[1].mxu0 }
 0x193   : > { %v789_v25 = vadd.f32 %v788_v23, %v693_v18  ;;  %v1668_v26 = vpop.f32.mrb[2].mxu0  ;;  %v2212_v18 = vpop.permute.xlu0 %1009 }
 0x194   : > { %v800_v29 = vadd.f32 %v1668_v26, %v708_v21  ;;  %v791_v38 = vpop.f32.mrb[3].mxu0  ;;  %v821_v42 = vmax.f32 %v797_v22, 0.0 }
 0x195   : > { %v792_v40 = vadd.f32 %v791_v38, %v698_v19  ;;  %v819_v44 = vmax.f32 %v789_v25, 0.0  ;;  %v2214_v19 = vpop.permute.xlu1 %1207  ;;  %v1782_v25 = vld [vmem:[%s2426_s8] sm:$0xff]  }
 0x196   : > { %v822_v43 = vmax.f32 %v800_v29, 0.0 }
 0x197   : > { %v820_v45 = vmax.f32 %v792_v40, 0.0  ;;  %v2216_v20 = vpop.permute.xlu0 %1017 }
 0x198   : > { %v828_v46 = vpack.c.bf16 %v822_v43, %v821_v42 }
 0x199   : > { %v1671_v48 = vpop.f32.mrb[4].mxu0  ;;  %v827_v49 = vpack.c.bf16 %v820_v45, %v819_v44  ;;  %v2218_v28 = vpop.permute.xlu1 %922 }
 0x19a   : > { %v813_v51 = vadd.f32 %v1671_v48, %v723_v47  ;;  %v804_v52 = vpop.f32.mrb[5].mxu0 }
 0x19b   : > { %v805_v54 = vadd.f32 %v804_v52, %v713_v24  ;;  %v1672_v55 = vpop.f32.mrb[6].mxu0  ;;  %1674 = vmatpush3.bf16.msra.mxu1 %v827_v49  ;;  %v2220_v30 = vpop.permute.xlu0 %1025 }
 0x19c   : > { %v816_v56 = vadd.f32 %v1672_v55, %v728_v53  ;;  %v807_v57 = vpop.f32.mrb[7].mxu0  ;;  %1675 = vmatprep.subr.bf16.mxu1 %v2431_v2  ;;  %v825_v59 = vmax.f32 %v813_v51, 0.0  ;;  %2433 = vst [vmem:[#allocation2_spill] sm:$0xff] %v2220_v30 }
 0x19d   : > { %v808_v58 = vadd.f32 %v807_v57, %v718_v39  ;;  %v823_v61 = vmax.f32 %v805_v54, 0.0  ;;  %v2222_v21 = vpop.permute.xlu1 %1013 }
 0x19e   : > { %v826_v60 = vmax.f32 %v816_v56, 0.0 }
 0x19f   : > { %v824_v62 = vmax.f32 %v808_v58, 0.0  ;;  %1676 = vmatpush3.bf16.msra.mxu1 %v828_v46  ;;  %v1034_v37 = vpop.permute.xlu0 %1033  ;;  %v960_v58 = vlaneseq }
 0x1a0   : > { %v830_v63 = vpack.c.bf16 %v826_v60, %v825_v59  ;;  %1677 = vmatprep.subr.bf16.mxu1 %v2431_v2 }
 0x1a1   : > { %v829_v1 = vpack.c.bf16 %v824_v62, %v823_v61  ;;  %v2224_v0 = vpop.permute.xlu1 %1113  ;;  %v961_v61 = vshrl.u32 %v960_v58, 7 }
 0x1a3   : > { %1678 = vmatpush3.bf16.msra.mxu1 %v829_v1  ;;  %v1042_v22 = vpop.permute.xlu0 %1041  ;;  %v962_v1 = vsub.s32 0, %v961_v61 }
 0x1a4   : > { %1679 = vmatprep.subr.bf16.mxu1 %v2431_v2 }
 0x1a5   : > { %v2226_v23 = vpop.permute.xlu1 %1117 }
 0x1a7   : > { %1680 = vmatpush3.bf16.msra.mxu1 %v830_v63  ;;  %v834_v24 = vpop.permute.xlu0 %833 }
 0x1a9   : > { %v2231_v26 = vpop.permute.xlu1 %1217 }
 0x1aa   : > { %1682 = vmatmul.mubr.msk.bf16.vlgmr.msra.gmra.mrb[0].mxu1 %vm836_vm1, %v534_v3 }
 0x1ab   : > { %1701 = vmatprep.mubr.bf16.mxu1 %v1782_v25  ;;  %v888_v29 = vpop.permute.xlu0 %887  ;;  %v1046_v25 = vsub.s32 1, %v961_v61 }
 0x1ad   : > { %v2233_v38 = vpop.permute.xlu1 %932 }
 0x1ae   : > { %2434 = vst [vmem:[#allocation3_spill] sm:$0xff] %v2233_v38 }
 0x1af   : > { %v893_v39 = vpop.permute.xlu0 %892 }
 0x1b1   : > { %v2235_v40 = vpop.permute.xlu1 %1021 }
 0x1b2   : > { %2435 = vst [vmem:[#allocation4_spill] sm:$0xff] %v2235_v40 }
 0x1b3   : > { %v2237_v41 = vpop.permute.xlu0 %1182 }
 0x1b5   : > { %v2239_v42 = vpop.permute.xlu1 %1121 }
 0x1b6   : > { %2436 = vst [vmem:[#allocation5_spill] sm:$0xff] %v2239_v42  ;;  %v1146_v42 = vsub.s32 2, %v961_v61 }
 0x1b7   : > { %v2241_v43 = vpop.permute.xlu0 %907 }
 0x1b9   : > { %v2243_v44 = vpop.permute.xlu1 %1125 }
 0x1ba   : > { %2437 = vst [vmem:[#allocation6_spill] sm:$0xff] %v2243_v44 }
 0x1bb   : > { %v2245_v45 = vpop.permute.xlu0 %1192 }
 0x1bd   : > { %v2247_v46 = vpop.permute.xlu1 %1227 }
 0x1be   : > { %2438 = vst [vmem:[#allocation7_spill] sm:$0xff] %v2247_v46 }
 0x1bf   : > { %v2249_v47 = vpop.permute.xlu0 %917 }
 0x1c1   : > { %v943_v48 = vpop.permute.xlu1 %942 }
 0x1c3   : > { %v2251_v49 = vpop.permute.xlu0 %1202 }
 0x1c5   : > { %v1030_v50 = vpop.permute.xlu1 %1029 }
 0x1c7   : > { %v2253_v51 = vpop.permute.xlu0 %927 }
 0x1c9   : > { %v1130_v52 = vpop.permute.xlu1 %1129 }
 0x1cb   : > { %v2255_v53 = vpop.permute.xlu0 %1212 }
 0x1cd   : > { %v1134_v54 = vpop.permute.xlu1 %1133 }
 0x1cf   : > { %v2257_v55 = vpop.permute.xlu0 %937 }
 0x1d0   : > { %2439 = vst [vmem:[#allocation8_spill] sm:$0xff] %v2257_v55 }
 0x1d1   : > { %v2259_v56 = vpop.permute.xlu1 %1237 }
 0x1d2   : > { %2440 = vst [vmem:[#allocation9_spill] sm:$0xff] %v2259_v56 }
 0x1d3   : > { %v2261_v57 = vpop.permute.xlu0 %1222 }
 0x1d4   : > { %2441 = vst [vmem:[#allocation10_spill] sm:$0xff] %v2261_v57 }
 0x1d5   : > { %v953_v59 = vpop.permute.xlu1 %952 }
 0x1d7   : > { %v948_v60 = vpop.permute.xlu0 %947 }
 0x1d9   : > { %v1038_v62 = vpop.permute.xlu1 %1037 }
 0x1db   : > { %v2263_v44 = vpop.permute.xlu0 %1232 }
 0x1dd   : > { %v2269_v57 = vpop.permute.xlu1 %1137 }
 0x1df   : > { %v958_v58 = vpop.permute.xlu0 %957 }
 0x27d   : > { %v874_v63 = vpop.f32.mrb[0].mxu1 }
 0x27e   : > { %v875_v3 = vadd.f32 %v874_v63, %v834_v24  ;;  %v1683_v2 = vpop.f32.mrb[1].mxu1 }
 0x27f   : > { %v877_v46 = vpop.f32.mrb[2].mxu1 }
 0x280   : > { %v1684_v30 = vpop.f32.mrb[3].mxu1  ;;  %v2265_v40 = vrot.slane %v875_v3, %v962_v1  ;;  %v2267_v56 = vrot.slane %v875_v3, %v1046_v25  ;;  %v2271_v55 = vrot.slane %v875_v3, %v1146_v42 }
 0x282   : > { %v964_v38 = vmul.f32 %v2265_v40, %v2170_v27  ;;  %v979_v24 = vmul.f32 %v2265_v40, %v958_v58  ;;  %v1063_v2 = vmul.f32 %v2267_v56, %v1042_v22  ;;  %v965_v46 = vmul.f32 %v2265_v40, %v888_v29  ;;  %v1142_v29 = vpop.permute.xlu1 %1141 }
 0x283   : > { %v1048_v30 = vmul.f32 %v2267_v56, %v2172_v4  ;;  %v976_v61 = vmul.f32 %v2265_v40, %v943_v48  ;;  %v977_v63 = vmul.f32 %v2265_v40, %v948_v60  ;;  %v1060_v42 = vmul.f32 %v2267_v56, %v1030_v50 }
 0x284   : > { %v1049_v1 = vmul.f32 %v2267_v56, %v2200_v13  ;;  %v1061_v27 = vmul.f32 %v2267_v56, %v1034_v37  ;;  %v978_v3 = vmul.f32 %v2265_v40, %v953_v59  ;;  %v1148_v22 = vmul.f32 %v2271_v55, %v2174_v34 }
 0x285   : > { %v1064_v25 = vadd.f32 %v1048_v30, %v964_v38  ;;  %v1062_v4 = vmul.f32 %v2267_v56, %v1038_v62  ;;  %v1149_v48 = vmul.f32 %v2271_v55, %v2176_v31  ;;  %v966_v50 = vmul.f32 %v2265_v40, %v893_v39 }
 0x286   : > { %v1065_v58 = vadd.f32 %v1049_v1, %v965_v46  ;;  %v2294_v60 = vmul.f32 %v2271_v55, %v1142_v29  ;;  %v2297_v13 = vmul.f32 %v2271_v55, %v1130_v52  ;;  %v967_v38 = vmul.f32 %v2265_v40, %v2178_v5 }
 0x287   : > { %v1164_v37 = vadd.f32 %v1148_v22, %v1064_v25  ;;  %v2301_v34 = vadd.f32 %v1063_v2, %v979_v24  ;;  %v2304_v59 = vmul.f32 %v2271_v55, %v1134_v54  ;;  %v1050_v31 = vmul.f32 %v2267_v56, %v2180_v6 }
 0x288   : > { %v1165_v62 = vadd.f32 %v1149_v48, %v1065_v58  ;;  %v2308_v39 = vadd.f32 %v1060_v42, %v976_v61  ;;  %v2310_v46 = vadd.f32 %v1061_v27, %v977_v63  ;;  %v1051_v30 = vmul.f32 %v2267_v56, %v2204_v15 }
 0x289   : > { %v1260_v52 = vadd.f32 %v2237_v41, %v1164_v37  ;;  %v2315_v1 = vadd.f32 %v1062_v4, %v978_v3  ;;  %v1066_v24 = vadd.f32 %v1050_v31, %v966_v50  ;;  %v1150_v54 = vmul.f32 %v2271_v55, %v2182_v32 }
 0x28a   : > { %v1261_v5 = vadd.f32 %v2186_v8, %v1165_v62  ;;  %v1067_v25 = vadd.f32 %v1051_v30, %v967_v38  ;;  %v1151_v6 = vmul.f32 %v2271_v55, %v2184_v7  ;;  %v968_v61 = vmul.f32 %v2265_v40, %v2188_v33 }
 0x28b   : > { %v1276_v2 = vmax.f32 %v1260_v52, 0.0  ;;  %v1166_v63 = vadd.f32 %v1150_v54, %v1066_v24  ;;  %v969_v15 = vmul.f32 %v2265_v40, %v2241_v43  ;;  %v1052_v8 = vmul.f32 %v2267_v56, %v2190_v9  ;;  %v2442_v54 = vld [vmem:[#allocation3_spill] sm:$0xff] }
 0x28c   : > { %v1277_v41 = vmax.f32 %v1261_v5, 0.0  ;;  %v1167_v42 = vadd.f32 %v1151_v6, %v1067_v25  ;;  %v1053_v32 = vmul.f32 %v2267_v56, %v2208_v17  ;;  %v1152_v27 = vmul.f32 %v2271_v55, %v2192_v10  ;;  %v2443_v25 = vld [vmem:[#allocation8_spill] sm:$0xff] }
 0x28d   : > { %v1153_v7 = vmul.f32 %v2271_v55, %v2194_v11  ;;  %v1262_v33 = vadd.f32 %v2245_v45, %v1166_v63  ;;  %v1068_v22 = vadd.f32 %v1052_v8, %v968_v61  ;;  %v970_v43 = vmul.f32 %v2265_v40, %v2198_v35  ;;  %v1248_v63 = vpop.permute.xlu1 %1247 }
 0x28e   : > { %v1292_v3 = vpack.c.bf16 %v1277_v41, %v1276_v2  ;;  %v1263_v29 = vadd.f32 %v2196_v12, %v1167_v42  ;;  %v1069_v9 = vadd.f32 %v1053_v32, %v969_v15  ;;  %v971_v4 = vmul.f32 %v2265_v40, %v2249_v47  ;;  %v2444_v41 = vld [vmem:[#allocation4_spill] sm:$0xff] }
 0x28f   : > { %v1054_v17 = vmul.f32 %v2267_v56, %v2202_v14  ;;  %v1278_v10 = vmax.f32 %v1262_v33, 0.0  ;;  %v1168_v58 = vadd.f32 %v1152_v27, %v1068_v22  ;;  %v1055_v11 = vmul.f32 %v2267_v56, %v2212_v18  ;;  %v1243_v22 = vpop.permute.xlu0 %1242 }
 0x290   : > { %1685 = vmatprep.subr.bf16.mxu1 %v1292_v3  ;;  %v1154_v45 = vmul.f32 %v2271_v55, %v2206_v16  ;;  %v1279_v35 = vmax.f32 %v1263_v29, 0.0  ;;  %v1169_v48 = vadd.f32 %v1153_v7, %v1069_v9  ;;  %v1155_v50 = vmul.f32 %v2271_v55, %v2210_v36  ;;  %v2448_v29 = vld [vmem:[#allocation7_spill] sm:$0xff]  ;;  %v2449_v9 = vld [vmem:[#allocation6_spill] sm:$0xff] }
 0x291   : > { %1686 = vmatpush3.bf16.msra.mxu1 %v1292_v3  ;;  %v1070_v12 = vadd.f32 %v1054_v17, %v970_v43  ;;  %v1264_v47 = vadd.f32 %v2251_v49, %v1168_v58  ;;  %v1071_v37 = vadd.f32 %v1055_v11, %v971_v4  ;;  %v972_v14 = vmul.f32 %v2265_v40, %v2218_v28  ;;  %v2447_v3 = vld [vmem:[#allocation5_spill] sm:$0xff] }
 0x292   : > { %v973_v38 = vmul.f32 %v2265_v40, %v2253_v51  ;;  %v1293_v18 = vpack.c.bf16 %v1279_v35, %v1278_v10  ;;  %v1265_v62 = vadd.f32 %v2214_v19, %v1169_v48  ;;  %v1056_v31 = vmul.f32 %v2267_v56, %v2222_v21 }
 0x293   : > { %v1170_v16 = vadd.f32 %v1154_v45, %v1070_v12  ;;  %v1280_v52 = vmax.f32 %v1264_v47, 0.0  ;;  %v1171_v30 = vadd.f32 %v1155_v50, %v1071_v37  ;;  %v1057_v36 = vmul.f32 %v2267_v56, %v2216_v20  ;;  %v1253_v12 = vpop.permute.xlu1 %1252  ;;  %v2450_v47 = vld [vmem:[#allocation9_spill] sm:$0xff] }
 0x294   : > { %v1156_v49 = vmul.f32 %v2271_v55, %v2224_v0  ;;  %1687 = vmatprep.subr.bf16.mxu1 %v1293_v18  ;;  %v1281_v28 = vmax.f32 %v1265_v62, 0.0  ;;  %v1072_v51 = vadd.f32 %v1056_v31, %v972_v14  ;;  %v1157_v19 = vmul.f32 %v2271_v55, %v2226_v23 }
 0x295   : > { %v1266_v5 = vadd.f32 %v2255_v53, %v1170_v16  ;;  %1688 = vmatpush3.bf16.msra.mxu1 %v1293_v18  ;;  %v1267_v24 = vadd.f32 %v2231_v26, %v1171_v30  ;;  %v1073_v21 = vadd.f32 %v1057_v36, %v973_v38  ;;  %v974_v2 = vmul.f32 %v2265_v40, %v2442_v54  ;;  %v2445_v26 = vld [vmem:[#allocation2_spill] sm:$0xff]  ;;  %v1784_v30 = vld [vmem:[%s2426_s8 + $0x10] sm:$0xff]   ;;  %v1785_v36 = vld [vmem:[%s2426_s8 + $0x18] sm:$0xff]  }
 0x296   : > { %v975_v20 = vmul.f32 %v2265_v40, %v2443_v25  ;;  %v1294_v6 = vpack.c.bf16 %v1281_v28, %v1280_v52  ;;  %v1172_v61 = vadd.f32 %v1156_v49, %v1072_v51  ;;  %v1058_v53 = vmul.f32 %v2267_v56, %v2444_v41  ;;  %v2446_v40 = vld [vmem:[#allocation10_spill] sm:$0xff]  ;;  %v1783_v52 = vld [vmem:[%s2426_s8 + $0x8] sm:$0xff]  }
 0x297   : > { %v1282_v0 = vmax.f32 %v1266_v5, 0.0  ;;  %v1176_v23 = vadd.f32 %v2297_v13, %v2308_v39  ;;  %v1283_v15 = vmax.f32 %v1267_v24, 0.0  ;;  %v1173_v8 = vadd.f32 %v1157_v19, %v1073_v21  ;;  %v1303_v49 = vpop.permute.xlu1 %1302 }
 0x298   : > { %v1059_v42 = vmul.f32 %v2267_v56, %v2445_v26  ;;  %v1177_v32 = vadd.f32 %v2304_v59, %v2310_v46  ;;  %1689 = vmatprep.subr.bf16.mxu1 %v1294_v6  ;;  %v1268_v27 = vadd.f32 %v2446_v40, %v1172_v61  ;;  %v1074_v7 = vadd.f32 %v1058_v53, %v974_v2 }
 0x299   : > { %v1158_v33 = vmul.f32 %v2271_v55, %v2447_v3  ;;  %1690 = vmatpush3.bf16.msra.mxu1 %v1294_v6  ;;  %v1295_v43 = vpack.c.bf16 %v1283_v15, %v1282_v0  ;;  %v1269_v13 = vadd.f32 %v2448_v29, %v1173_v8  ;;  %v1159_v4 = vmul.f32 %v2271_v55, %v2449_v9 }
 0x29a   : > { %v1075_v39 = vadd.f32 %v1059_v42, %v975_v20  ;;  %v1162_v56 = vmul.f32 %v2271_v55, %v2269_v57  ;;  %v1284_v59 = vmax.f32 %v1268_v27, 0.0  ;;  %v1179_v17 = vadd.f32 %v2294_v60, %v2301_v34  ;;  %v1258_v57 = vpop.permute.xlu0 %1257 }
 0x29b   : > { %v1174_v46 = vadd.f32 %v1158_v33, %v1074_v7  ;;  %1691 = vmatprep.subr.bf16.mxu1 %v1295_v43  ;;  %v1285_v10 = vmax.f32 %v1269_v13, 0.0  ;;  %v1272_v11 = vadd.f32 %v1243_v22, %v1176_v23  ;;  %v1273_v45 = vadd.f32 %v1248_v63, %v1177_v32  ;;  %v1313_v5 = vpop.permute.xlu1 %1312 }
 0x29c   : > { %v1175_v58 = vadd.f32 %v1159_v4, %v1075_v39  ;;  %v1178_v35 = vadd.f32 %v1162_v56, %v2315_v1  ;;  %v1275_v38 = vadd.f32 %v1258_v57, %v1179_v17 }
 0x29d   : > { %v1270_v48 = vadd.f32 %v2263_v44, %v1174_v46  ;;  %1692 = vmatpush3.bf16.msra.mxu1 %v1295_v43  ;;  %v1296_v50 = vpack.c.bf16 %v1285_v10, %v1284_v59  ;;  %v1288_v60 = vmax.f32 %v1272_v11, 0.0  ;;  %v1289_v34 = vmax.f32 %v1273_v45, 0.0  ;;  %v568_v46 = vld [vmem:[%s2428_s10] sm:$0x3] }
 0x29e   : > { %v1271_v37 = vadd.f32 %v2450_v47, %v1175_v58  ;;  %v1274_v18 = vadd.f32 %v1253_v12, %v1178_v35  ;;  %v1291_v31 = vmax.f32 %v1275_v38, 0.0  ;;  %v1308_v28 = vpop.permute.xlu0 %1307  ;;  %v2451_v43 = vmov 0.0  }
 0x29f   : > { %v1286_v55 = vmax.f32 %v1270_v48, 0.0  ;;  %1693 = vmatprep.subr.bf16.mxu1 %v1296_v50  ;;  %v1298_v16 = vpack.c.bf16 %v1289_v34, %v1288_v60  ;;  %v1323_v54 = vpop.permute.xlu1 %1322 }
 0x2a0   : > { %v1287_v14 = vmax.f32 %v1271_v37, 0.0  ;;  %v1290_v1 = vmax.f32 %v1274_v18, 0.0 }
 0x2a1   : > { %1694 = vmatpush3.bf16.msra.mxu1 %v1296_v50 }
 0x2a2   : > { %v1297_v62 = vpack.c.bf16 %v1287_v14, %v1286_v55  ;;  %v1299_v44 = vpack.c.bf16 %v1291_v31, %v1290_v1  ;;  %v1318_v51 = vpop.permute.xlu0 %1317 }
 0x2a3   : > { %v1333_v8 = vpop.permute.xlu1 %1332 }
 0x2a4   : > { %1695 = vmatprep.subr.bf16.mxu1 %v1297_v62 }
 0x2a5   : > { %1696 = vmatpush3.bf16.msra.mxu1 %v1297_v62 }
 0x2a6   : > { %1697 = vmatprep.subr.bf16.mxu1 %v1298_v16  ;;  %v1328_v0 = vpop.permute.xlu0 %1327 }
 0x2a7   : > { %v1444_v17 = vpop.permute.xlu1 %1443 }
 0x2a9   : > { %1698 = vmatpush3.bf16.msra.mxu1 %v1298_v16 }
 0x2aa   : > { %1699 = vmatprep.subr.bf16.mxu1 %v1299_v44  ;;  %v1338_v27 = vpop.permute.xlu0 %1337 }
 0x2ad   : > { %1700 = vmatpush3.bf16.msra.mxu1 %v1299_v44 }
 0x2b0   : > { %1702 = vmatmul.mubr.bf16.vlgmr.msra.gmra.mrb[4].mxu1 %v1783_v52 }
 0x2b1   : > { %1705 = vmatprep.mubr.bf16.mxu1 %v1784_v30 }
 0x2b8   : > { %1706 = vmatmul.mubr.bf16.gmra.mrb[8].mxu1 %v1785_v36 }
 0x383   : > { %v1703_v19 = vpop.f32.mrb[4].mxu1 }
 0x384   : > { %v1407_v24 = vadd.f32 %v1703_v19, %v1313_v5  ;;  %v1398_v21 = vpop.f32.mrb[5].mxu1 }
 0x385   : > { %v1399_v2 = vadd.f32 %v1398_v21, %v1303_v49  ;;  %v1704_v25 = vpop.f32.mrb[6].mxu1 }
 0x386   : > { %v1410_v20 = vadd.f32 %v1704_v25, %v1318_v51  ;;  %v1401_v6 = vpop.f32.mrb[7].mxu1  ;;  %v1431_v41 = vmax.f32 %v1407_v24, 0.0 }
 0x387   : > { %v1402_v61 = vadd.f32 %v1401_v6, %v1308_v28  ;;  %v1429_v63 = vmax.f32 %v1399_v2, 0.0 }
 0x388   : > { %v1432_v53 = vmax.f32 %v1410_v20, 0.0 }
 0x389   : > { %v1430_v23 = vmax.f32 %v1402_v61, 0.0 }
 0x38a   : > { %v1438_v15 = vpack.c.bf16 %v1432_v53, %v1431_v41 }
 0x38b   : > { %v1437_v26 = vpack.c.bf16 %v1430_v23, %v1429_v63  ;;  %v1707_v42 = vpop.f32.mrb[8].mxu1 }
 0x38c   : > { %v1423_v32 = vadd.f32 %v1707_v42, %v1333_v8  ;;  %v1414_v40 = vpop.f32.mrb[9].mxu1 }
 0x38d   : > { %v1415_v7 = vadd.f32 %v1414_v40, %v1323_v54  ;;  %v1708_v3 = vpop.f32.mrb[10].mxu1  ;;  %1710 = vmatpush3.bf16.msra.mxu0 %v1437_v26 }
 0x38e   : > { %v1426_v33 = vadd.f32 %v1708_v3, %v1338_v27  ;;  %v1417_v22 = vpop.f32.mrb[11].mxu1  ;;  %1711 = vmatprep.subr.bf16.mxu0 %v2451_v43  ;;  %v1435_v13 = vmax.f32 %v1423_v32, 0.0 }
 0x38f   : > { %v1418_v29 = vadd.f32 %v1417_v22, %v1328_v0  ;;  %v1433_v9 = vmax.f32 %v1415_v7, 0.0 }
 0x390   : > { %v1436_v39 = vmax.f32 %v1426_v33, 0.0 }
 0x391   : > { %v1434_v4 = vmax.f32 %v1418_v29, 0.0  ;;  %1712 = vmatpush3.bf16.msra.mxu0 %v1438_v15 }
 0x392   : > { %v1440_v56 = vpack.c.bf16 %v1436_v39, %v1435_v13  ;;  %1713 = vmatprep.subr.bf16.mxu0 %v2451_v43 }
 0x393   : > { %v1439_v59 = vpack.c.bf16 %v1434_v4, %v1433_v9 }
 0x395   : > { %1714 = vmatpush3.bf16.msra.mxu0 %v1439_v59 }
 0x396   : > { %1715 = vmatprep.subr.bf16.mxu0 %v2451_v43 }
 0x399   : > { %1716 = vmatpush3.bf16.msra.mxu0 %v1440_v56 }
 0x39c   : > { %1718 = vmatmul.mubr.msk.bf16.vlgmr.msra.gmra.mrb[8].mxu0 %vm836_vm1, %v568_v46 }
 0x46f   : > { %v1483_v10 = vpop.f32.mrb[8].mxu0 }
 0x470   : > { %v1484_v58 = vadd.f32 %v1483_v10, %v1444_v17  ;;  %v1719_v11 = vpop.f32.mrb[9].mxu0 }
 0x471   : > { %v1486_v45 = vpop.f32.mrb[10].mxu0 }
 0x472   : > { %1490 = vst.msk [vmem:[%s468_s17] sm:$0x7] %vm1489_vm2, %v1484_v58  ;;  %v1720_v35 = vpop.f32.mrb[11].mxu0 }
 0x473 PF: > { %s22_s23 = sadd.s32 1, %s1808_s23   ;;  %s2452_s21 = smov %s1804_s22 }
 0x474   : > { %p19_p5 = scmp.ge.s32.totalorder %s22_s23, 4   ;;  %s2453_s22 = smov %s2455_s24 }
 0x476   :  { %21 = sbr.rel (!%p19_p5) target bundleno = 2 (0x2), region = 104 }

</bundles_post_ra>
